<compile_context>
chip_gen: v6e
topology: v6e:2x2x1
jax: 0.10.0
libtpu: 0.0.40
codegen_flags: <defaults>
</compile_context>

<pallas_src>
import jax
import jax.numpy as jnp
from jax.experimental import pallas as pl
from jax.experimental.pallas import tpu as pltpu


def channel_attention_kernel(x_ref, w1_ref, b1_ref, w2_ref, b2_ref, o_ref):
    # x_ref: (TB, C) f32, w1_ref: (C, H) bf16, b1_ref: (1, H) f32,
    # w2_ref: (H, C) bf16, b2_ref: (1, C) f32, o_ref: (TB, C)
    x_f32 = x_ref[...].astype(jnp.float32)
    x_bf16 = x_f32.astype(jnp.bfloat16)

    # Linear(in_dim -> in_dim // reduction) + ReLU  (bf16 MXU, f32 accumulate)
    h = jnp.dot(x_bf16, w1_ref[...], preferred_element_type=jnp.float32) + b1_ref[...]
    h = jnp.maximum(h, 0.0)

    # Linear(in_dim // reduction -> in_dim) + Sigmoid  (bf16 MXU, f32 accumulate)
    logits = (
        jnp.dot(h.astype(jnp.bfloat16), w2_ref[...], preferred_element_type=jnp.float32)
        + b2_ref[...]
    )
    attn = jax.nn.sigmoid(logits)

    # Elementwise gating with the original (f32) activations.
    o_ref[...] = (x_f32 * attn).astype(o_ref.dtype)


def _pick_block_b(B, C):
    """Largest row tile (multiple of 8, dividing B) whose double-buffered f32 in/out
    tiles fit comfortably inside the default scoped-VMEM budget."""
    # Double-buffered x-in + out tiles cost ~ 4 * block_b * C * 4 bytes. Keep under ~24 MiB.
    cap = max(8, (24 * 1024 * 1024) // (16 * C))
    cap = min(cap, 1024)  # diminishing returns beyond ~1k rows
    if B <= cap:
        return B
    start = cap - (cap % 8)
    for cand in range(start, 7, -8):
        if B % cand == 0:
            return cand
    return B  # no clean multiple-of-8 divisor: fall back to a single block (still correct)


def channel_attention(x, w1, b1, w2, b2, *, block_b=None):
    """x: (B, C) float32. w1: (C, H), b1: (H,), w2: (H, C), b2: (C,)."""
    B, C = x.shape
    H = w1.shape[1]

    if block_b is None:
        block_b = _pick_block_b(B, C)
    assert B % block_b == 0, "block_b must divide B"
    assert block_b == B or block_b % 8 == 0, "row tile must be a multiple of 8 (sublane)"

    # Pre-cast weights to bf16 (native MXU operand dtype); biases stay f32 (added post-acc).
    w1_bf16 = w1.astype(jnp.bfloat16)
    w2_bf16 = w2.astype(jnp.bfloat16)
    b1_2d = b1.reshape(1, H).astype(jnp.float32)
    b2_2d = b2.reshape(1, C).astype(jnp.float32)

    grid = (B // block_b,)

    cost = pl.CostEstimate(
        flops=4 * B * C * H + 3 * B * C,
        transcendentals=B * C,  # sigmoid exp
        bytes_accessed=(
            B * C * x.dtype.itemsize  # x in
            + B * C * x.dtype.itemsize  # out
            + 2 * C * H * 2  # bf16 weights
            + (H + C) * 4  # biases
        ),
    )

    return pl.pallas_call(
        channel_attention_kernel,
        out_shape=jax.ShapeDtypeStruct((B, C), x.dtype),
        grid_spec=pltpu.PrefetchScalarGridSpec(
            num_scalar_prefetch=0,
            grid=grid,
            in_specs=[
                pl.BlockSpec((block_b, C), lambda i: (i, 0)),  # x tile (double-buffered)
                pl.BlockSpec((C, H), lambda i: (0, 0)),        # W1 (resident)
                pl.BlockSpec((1, H), lambda i: (0, 0)),        # b1
                pl.BlockSpec((H, C), lambda i: (0, 0)),        # W2
                pl.BlockSpec((1, C), lambda i: (0, 0)),        # b2
            ],
            out_specs=pl.BlockSpec((block_b, C), lambda i: (i, 0)),
        ),
        compiler_params=pltpu.CompilerParams(
            dimension_semantics=("parallel",),  # shards grid steps across v7x's 2 TCs
        ),
        cost_estimate=cost,
    )(x, w1_bf16, b1_2d, w2_bf16, b2_2d)


def reference_channel_attention(x, w1, b1, w2, b2):
    h = jnp.maximum(x @ w1 + b1, 0.0)
    attn = jax.nn.sigmoid(h @ w2 + b2)
    return x * attn


if __name__ == "__main__":
    # Module config: in_dim=128, reduction=16 -> hidden = 8. Batch kept small but large
    # enough (and explicitly tiled) to exercise a multi-step pipelined grid.
    B, C, R = 256, 128, 16
    Hdim = C // R

    key = jax.random.PRNGKey(0)
    kx, kw1, kb1, kw2, kb2 = jax.random.split(key, 5)

    x = jax.random.normal(kx, (B, C), dtype=jnp.float32)

    # Deterministic init mirroring nn.Linear's uniform(-1/sqrt(fan_in), 1/sqrt(fan_in)).
    lim1 = 1.0 / jnp.sqrt(jnp.float32(C))
    lim2 = 1.0 / jnp.sqrt(jnp.float32(Hdim))
    w1 = jax.random.uniform(kw1, (C, Hdim), minval=-lim1, maxval=lim1, dtype=jnp.float32)
    b1 = jax.random.uniform(kb1, (Hdim,), minval=-lim1, maxval=lim1, dtype=jnp.float32)
    w2 = jax.random.uniform(kw2, (Hdim, C), minval=-lim2, maxval=lim2, dtype=jnp.float32)
    b2 = jax.random.uniform(kb2, (C,), minval=-lim2, maxval=lim2, dtype=jnp.float32)

    # Explicit block_b=64 -> grid=(4,): multi-step pipeline even at this small test size.
    out = channel_attention(x, w1, b1, w2, b2, block_b=64)
    out = jax.block_until_ready(out)

    ref = reference_channel_attention(x, w1, b1, w2, b2)
    assert out.shape == (B, C)
    # Tolerance loosened vs f32 reference because matmul operands are bf16 (f32 accumulate).
    assert jnp.allclose(out, ref, atol=2e-2, rtol=2e-2), "Pallas kernel mismatch vs reference"

    print("KERNEL_OK")
</pallas_src>

<mosaic_0001>
module attributes {stable_mosaic.version = 11 : i64} {
  func.func @channel_attention_kernel(%arg0: i32, %arg1: memref<64x128xf32, #tpu.memory_space<vmem>>, %arg2: memref<128x8xbf16, #tpu.memory_space<vmem>>, %arg3: memref<1x8xf32, #tpu.memory_space<vmem>>, %arg4: memref<8x128xbf16, #tpu.memory_space<vmem>>, %arg5: memref<1x128xf32, #tpu.memory_space<vmem>>, %arg6: memref<64x128xf32, #tpu.memory_space<vmem>>) attributes {dimension_semantics = [#tpu.dimension_semantics<parallel>], iteration_bounds = array<i64: 4>, scalar_prefetch = 0 : i64, scratch_operands = 0 : i64, tpu.core_type = #tpu.core_type<tc>, window_params = [{transform_indices = @transform_0, window_bounds = array<i64: 64, 128>}, {pipeline_mode = #tpu.pipeline_mode<synchronous>, transform_indices = @transform_1, window_bounds = array<i64: 128, 8>}, {pipeline_mode = #tpu.pipeline_mode<synchronous>, transform_indices = @transform_2, window_bounds = array<i64: 1, 8>}, {pipeline_mode = #tpu.pipeline_mode<synchronous>, transform_indices = @transform_3, window_bounds = array<i64: 8, 128>}, {pipeline_mode = #tpu.pipeline_mode<synchronous>, transform_indices = @transform_4, window_bounds = array<i64: 1, 128>}, {transform_indices = @transform_5, window_bounds = array<i64: 64, 128>}]} {
    %c0 = arith.constant 0 : index
    %c0_0 = arith.constant 0 : index
    %0 = vector.load %arg1[%c0, %c0_0] : memref<64x128xf32, #tpu.memory_space<vmem>>, vector<64x128xf32>
    %1 = arith.truncf %0 : vector<64x128xf32> to vector<64x128xbf16>
    %c0_1 = arith.constant 0 : index
    %c0_2 = arith.constant 0 : index
    %2 = vector.load %arg2[%c0_1, %c0_2] : memref<128x8xbf16, #tpu.memory_space<vmem>>, vector<128x8xbf16>
    %cst = arith.constant dense<0.000000e+00> : vector<64x8xf32>
    %3 = tpu.matmul %1, %2, %cst {dimension_numbers = #tpu.dot_dimension_numbers<[1], [0], [0], [1], [0, 0, 1, 1], [], []>} : vector<64x128xbf16>, vector<128x8xbf16>, vector<64x8xf32> -> vector<64x8xf32>
    %c0_3 = arith.constant 0 : index
    %c0_4 = arith.constant 0 : index
    %4 = vector.load %arg3[%c0_3, %c0_4] : memref<1x8xf32, #tpu.memory_space<vmem>>, vector<1x8xf32>
    %5 = vector.broadcast %4 : vector<1x8xf32> to vector<64x8xf32>
    %6 = arith.addf %3, %5 : vector<64x8xf32>
    %cst_5 = arith.constant 0.000000e+00 : f32
    %7 = vector.broadcast %cst_5 : f32 to vector<64x8xf32>
    %8 = arith.maximumf %6, %7 : vector<64x8xf32>
    %9 = arith.truncf %8 : vector<64x8xf32> to vector<64x8xbf16>
    %c0_6 = arith.constant 0 : index
    %c0_7 = arith.constant 0 : index
    %10 = vector.load %arg4[%c0_6, %c0_7] : memref<8x128xbf16, #tpu.memory_space<vmem>>, vector<8x128xbf16>
    %cst_8 = arith.constant dense<0.000000e+00> : vector<64x128xf32>
    %11 = tpu.matmul %9, %10, %cst_8 {dimension_numbers = #tpu.dot_dimension_numbers<[1], [0], [0], [1], [0, 0, 1, 1], [], []>} : vector<64x8xbf16>, vector<8x128xbf16>, vector<64x128xf32> -> vector<64x128xf32>
    %c0_9 = arith.constant 0 : index
    %c0_10 = arith.constant 0 : index
    %12 = vector.load %arg5[%c0_9, %c0_10] : memref<1x128xf32, #tpu.memory_space<vmem>>, vector<1x128xf32>
    %13 = vector.broadcast %12 : vector<1x128xf32> to vector<64x128xf32>
    %14 = arith.addf %11, %13 : vector<64x128xf32>
    %15 = arith.negf %14 : vector<64x128xf32>
    %16 = math.exp %15 : vector<64x128xf32>
    %cst_11 = arith.constant 1.000000e+00 : f32
    %17 = vector.broadcast %cst_11 : f32 to vector<64x128xf32>
    %18 = arith.addf %17, %16 : vector<64x128xf32>
    %19 = arith.divf %17, %18 : vector<64x128xf32>
    %20 = arith.mulf %0, %19 : vector<64x128xf32>
    %c0_12 = arith.constant 0 : index
    %c0_13 = arith.constant 0 : index
    %21 = vector.load %arg6[%c0_12, %c0_13] : memref<64x128xf32, #tpu.memory_space<vmem>>, vector<64x128xf32>
    tpu.vector_store %arg6[%c0_12, %c0_13], %20 {strides = array<i32>} : memref<64x128xf32, #tpu.memory_space<vmem>>, vector<64x128xf32>,
    return
  }
  func.func @transform_0(%arg0: i32) -> (i32, i32) {
    %c0_i32 = arith.constant 0 : i32
    %c0_i32_0 = arith.constant 0 : i32
    return %arg0, %c0_i32 : i32, i32
  }
  func.func @transform_1(%arg0: i32) -> (i32, i32) {
    %c0_i32 = arith.constant 0 : i32
    %c0_i32_0 = arith.constant 0 : i32
    %c0_i32_1 = arith.constant 0 : i32
    return %c0_i32, %c0_i32_0 : i32, i32
  }
  func.func @transform_2(%arg0: i32) -> (i32, i32) {
    %c0_i32 = arith.constant 0 : i32
    %c0_i32_0 = arith.constant 0 : i32
    %c0_i32_1 = arith.constant 0 : i32
    return %c0_i32, %c0_i32_0 : i32, i32
  }
  func.func @transform_3(%arg0: i32) -> (i32, i32) {
    %c0_i32 = arith.constant 0 : i32
    %c0_i32_0 = arith.constant 0 : i32
    %c0_i32_1 = arith.constant 0 : i32
    return %c0_i32, %c0_i32_0 : i32, i32
  }
  func.func @transform_4(%arg0: i32) -> (i32, i32) {
    %c0_i32 = arith.constant 0 : i32
    %c0_i32_0 = arith.constant 0 : i32
    %c0_i32_1 = arith.constant 0 : i32
    return %c0_i32, %c0_i32_0 : i32, i32
  }
  func.func @transform_5(%arg0: i32) -> (i32, i32) {
    %c0_i32 = arith.constant 0 : i32
    %c0_i32_0 = arith.constant 0 : i32
    return %arg0, %c0_i32 : i32, i32
  }
}

</mosaic_0001>

<bundles_post_ra>
// kernel: tpu_custom_call.1
= control target key start
LH: loop header
LB: loop body
LE: loop exit
PB: predicated region body
PF: predicated region fallthrough
CT: control target
= control target key end

     0   :  { %10 = vsyncpa [#allocation3], 0  ;;  %s1192_s0 = inlined_call_operand.hbm [shape: f32[256,128], index: 0, kind: input, shape index: {}]   ;;  %s1193_s1 = inlined_call_operand.vmem [shape: bf16[128,8], index: 1, kind: input, shape index: {}]   ;;  %s1194_s2 = inlined_call_operand.vmem [shape: f32[1,8], index: 2, kind: input, shape index: {}]   ;;  %s1195_s3 = inlined_call_operand.vmem [shape: bf16[8,128], index: 3, kind: input, shape index: {}]   ;;  %s1196_s4 = inlined_call_operand.vmem [shape: f32[1,128], index: 4, kind: input, shape index: {}]   ;;  %s1197_s5 = inlined_call_operand.hbm [shape: f32[256,128], index: 5, kind: output, shape index: {}]  }
   0x1   :  { %12 = vsyncpa [#allocation3 + $0x1], 0 }
   0x2   :  { %13 = vsyncpa [#allocation4], 0 }
   0x3   :  { %15 = vsyncpa [#allocation4 + $0x1], 0  ;;  %s957_s18 = smov 0   ;;  %s959_s19 = smov 0  }
   0x4   :  { %s961_s20 = smov 0   ;;  %s963_s21 = smov 0  }
   0x5 LB: > { %s978_s22 = sadd.s32 4294967295, %s919_s21   ;;  %s647_s23 = sadd.s32 4294967294, %s919_s21   ;;  %s919_s21 = sphi %s963_s21, %s1211_s21   ;;  %s915_s20 = sphi %s961_s20, %s1210_s20   ;;  %s911_s19 = sphi %s959_s19, %s1209_s19   ;;  %s907_s18 = sphi %s957_s18, %s1208_s18  }
   0x6   : > { %s982_s24 = sadd.s32 1, %s919_s21   ;;  %s28_s25 = sadd.s32 1, %s915_s20 }
   0x7   : > { %s25_s26 = ssub.s32 %s919_s21, %s982_s24  ;;  %p35_p0 = scmp.ne.s32.totalorder %s915_s20, %s911_s19 }
   0x8   : > { %p26_p1 = scmp.eq.s32.totalorder %s25_s26, 0  ;;  %p36_p2 = scmp.eq.s32.totalorder %s919_s21, 0 }
   0x9   : > { %p41_p3 = scmp.ne.s32.totalorder %s911_s19, %s907_s18  ;;  %p42_p4 = scmp.eq.s32.totalorder %s978_s22, 0 }
   0xa   : > { %s994_s27 = scalar_select %p26_p1, %s915_s20, %s28_s25  }
   0xb   : > { %p996_p5 = por %p36_p2, %p35_p0  ;;  %p1000_p6 = por %p42_p4, %p41_p3 }
   0xc   : > { %p149_p7 = scmp.eq.s32.totalorder %s978_s22, 3  ;;  %p155_p8 = scmp.eq.s32.totalorder %s647_s23, 3 }
   0xd   : > { %s1201_s29 = scalar_select %p1000_p6, 1, 0 }
   0xe   : > { %p749_p9 = scmp.lt.s32.totalorder %s919_s21, 4  ;;  %p1006_p10 = por %p149_p7, %p35_p0 }
   0xf   : > { %p1010_p11 = por %p155_p8, %p41_p3  ;;  %s187_s7 = sand.u32 1, %s915_s20  }
  0x10   : > { %s1202_s30 = scalar_select %p1006_p10, 1, 0 }
  0x11   : > { %s1203_s6 = scalar_select %p1010_p11, 1, 0 }
  0x12   : > { %s683_s8 = sshll.u32 %s919_s21, 10  ;;  %s650_s9 = sshll.u32 %s187_s7, 6 }
  0x13   : > { %s1019_s12 = scalar_lea.hbm %s1192_s0, %s683_s8  ;;  %s191_s13 = scalar_lea.vmem [#allocation2], %s650_s9 }
  0x14   : > { %s198_s14 = sshll.u32 %s191_s13, 4  ;;  %p1023_p12 = pnand %p749_p9, %p996_p5  ;;  %s1027_s14 = int_to_ptr.vmem [resolvable:$true] %s198_s14 }
  0x15   : > { %s1029_s16 = scalar_lea.sflag [#allocation3], %s187_s7  ;;  %s827_s17 = scalar_lea.hbm %s1019_s12, 1024 }
  0x16   : > { %p828_p13 = scmp.ne.s32.totalorder %s1019_s12, %s827_s17  ;;  %p829_p0 = pneg %p1023_p12 }
  0x17   : > { %s832_s26 = scalar_lea.hbm %s1192_s0, 4096  ;;  %p833_p3 = scmp.lt.s32.totalorder %s1019_s12, %s1192_s0 }
  0x18   : > { %p830_p1 = pnand %p829_p0, %p828_p13  ;;  %p834_p4 = scmp.lt.s32.totalorder %s832_s26, %s827_s17 }
  0x1a   : > { %p831_p2 = pneg %p830_p1  ;;  %p835_p5 = por %p834_p4, %p833_p3 }
  0x1c   : > { %p836_p7 = pnand %p835_p5, %p831_p2 }
  0x1e   : > { %839 = shalt.err (!%p836_p7)
}
  0x1f   : > { %s840_s7 = scalar_lea.vmem %s1027_s14, 1024  ;;  %s921_s9 = smov [#allocation2]  }
  0x20   : > { %p841_p8 = scmp.ne.s32.totalorder %s1027_s14, %s840_s7  ;;  %s845_s10 = sshll.u32 %s921_s9, 4  ;;  %s846_s10 = int_to_ptr.vmem [resolvable:$false] %s845_s10 }
  0x21   : > { %s847_s11 = scalar_lea.vmem %s846_s10, 2048  ;;  %p848_p1 = scmp.lt.s32.totalorder %s1027_s14, %s846_s10 }
  0x22   : > { %p843_p9 = pnand %p841_p8, %p829_p0  ;;  %p849_p11 = scmp.lt.s32.totalorder %s847_s11, %s840_s7 }
  0x24   : > { %p844_p13 = pneg %p843_p9  ;;  %p850_p10 = por %p849_p11, %p848_p1 }
  0x26   : > { %p851_p6 = pnand %p850_p10, %p844_p13 }
  0x28   : > { %854 = shalt.err (!%p851_p6)
}
  0x29   : > { %s922_s13 = smov 128   ;;  %s923_s17 = smov 8  }
  0x2a   : > { %744 = dma.hbm_to_vmem [thread:$0]  (!%p1023_p12), %s1019_s12, 1024, %s1027_s14, %s1029_s16, %s922_s13, %s922_s13, %s923_s17  }
  0x2b   : > { %p653_p0 = scmp.ge.s32.totalorder %s919_s21, 1  ;;  %p206_p2 = scmp.lt.s32.totalorder %s919_s21, 5 }
  0x2d   : > { %p207_p3 = pnand %p653_p0, %p206_p2 }
  0x2e   : > { %s1053_s23 = sand.u32 (!%p207_p3), 1, %s911_s19   ;;  %p1205_p6 = scmp.ne.s32.totalorder (!%p207_p3), %s1201_s29, 0 }
  0x2f   : > { %210 = sbr.rel (%p207_p3) target bundleno = 549 (0x225), region = 40  ;;  %s654_s25 = sshll.u32 (!%p207_p3), %s1053_s23, 6 }
  0x30   : > { %s213_s26 = scalar_lea.sflag (!%p207_p3), [#allocation3], %s1053_s23  ;;  %s1059_s28 = scalar_lea.vmem (!%p207_p3), [#allocation2], %s654_s25 }
  0x34   : > { %898 = dma.done.wait (%p1205_p6), %s213_s26, 1024  }
  0x35   : > { %900 = vsyncadd (%p1205_p6), %s213_s26, 4294966272  ;;  %v787_v0 = vld [vmem:[%s1193_s1 + $0x38] sm:$0xff]   ;;  %v788_v1 = vld [vmem:[%s1193_s1 + $0x30] sm:$0xff]   ;;  %vm427_vm0 = vcmask 1043456   ;;  %vm414_vm1 = vcmask 64512   ;;  %s242_s10 = scalar_lea.vmem [#allocation5], %s654_s25 }
  0x36   : > { %702 = vmatprep.subr.bf16.mxu0 %v787_v0  ;;  %v789_v2 = vld [vmem:[%s1193_s1 + $0x28] sm:$0xff]   ;;  %v790_v3 = vld [vmem:[%s1193_s1 + $0x20] sm:$0xff]   ;;  %v791_v7 = vld [vmem:[%s1193_s1 + $0x18] sm:$0xff]   ;;  %s684_s25 = sshll.u32 %s978_s22, 10  ;;  %s574_s11 = sshll.u32 %s242_s10, 4  ;;  %s1149_s11 = int_to_ptr.vmem [resolvable:$true] %s574_s11 }
  0x37   : > { %703 = vmatpush3.bf16.msra.mxu0 %v787_v0  ;;  %v1078_v4 = vld [vmem:[%s1059_s28] sm:$0xff]  ;;  %v1081_v5 = vld [vmem:[%s1059_s28 + $0x8] sm:$0xff]  ;;  %v792_v8 = vld [vmem:[%s1193_s1 + $0x10] sm:$0xff]   ;;  %s1147_s26 = scalar_lea.hbm %s1197_s5, %s684_s25  ;;  %s561_s22 = scalar_lea.sflag [#allocation4], %s1053_s23 }
  0x38   : > { %704 = vmatprep.subr.bf16.mxu0 %v788_v1  ;;  %v254_v6 = vpack.c.bf16 %v1081_v5, %v1078_v4  ;;  %v793_v9 = vld [vmem:[%s1193_s1 + $0x8] sm:$0xff]   ;;  %v794_v10 = vld [vmem:[%s1193_s1] sm:$0xff]   ;;  %v1098_v11 = vld [vmem:[%s1059_s28 + $0x10] sm:$0xff]  ;;  %s855_s12 = scalar_lea.vmem %s1149_s11, 1024  ;;  %p1206_p11 = scmp.ne.s32.totalorder %s1202_s30, 0 }
  0x39   : > { %v1101_v12 = vld [vmem:[%s1059_s28 + $0x18] sm:$0xff]  ;;  %v1104_v13 = vld [vmem:[%s1059_s28 + $0x20] sm:$0xff]  ;;  %v1107_v14 = vld [vmem:[%s1059_s28 + $0x28] sm:$0xff]  ;;  %p856_p10 = scmp.ne.s32.totalorder %s1149_s11, %s855_s12  ;;  %s924_s14 = smov [#allocation5]  }
  0x3a   : > { %718 = vmatprep.mubr.bf16.mxu0 %v254_v6  ;;  %v255_v15 = vpack.c.bf16 %v1101_v12, %v1098_v11  ;;  %v256_v16 = vpack.c.bf16 %v1107_v14, %v1104_v13  ;;  %v1114_v17 = vld [vmem:[%s1059_s28 + $0x30] sm:$0xff]  ;;  %v1117_v18 = vld [vmem:[%s1059_s28 + $0x38] sm:$0xff]  ;;  %v406_v20 = vld [vmem:[%s1195_s3] sm:$0xf]  ;;  %s859_s15 = sshll.u32 %s924_s14, 4  ;;  %s860_s15 = int_to_ptr.vmem [resolvable:$false] %s859_s15 }
  0x3b   : > { %705 = vmatpush3.bf16.msra.mxu0 %v788_v1  ;;  %v257_v19 = vpack.c.bf16 %v1117_v18, %v1114_v17  ;;  %736 = vmatprep.subr.msk.bf16.mxu1 %vm427_vm0, %v406_v20  ;;  %v429_v21 = vsel %vm427_vm0, %v406_v20, 0  ;;  %v656_v24 = vld [vmem:[%s1194_s2] ss:$0 sm:$0xff]  ;;  %p857_p12 = pnand %p856_p10, %p1206_p11  ;;  %s861_s16 = scalar_lea.vmem %s860_s15, 2048 }
  0x3c   : > { %706 = vmatprep.subr.bf16.mxu0 %v789_v2  ;;  %727 = vmatpush3.bf16.msra.mxu1 %v429_v21  ;;  %v665_v51 = vld [vmem:[%s1196_s4] ss:$0 sm:$0xff]  ;;  %p862_p5 = scmp.lt.s32.totalorder %s1149_s11, %s860_s15  ;;  %p863_p7 = scmp.lt.s32.totalorder %s861_s16, %s855_s12 }
  0x3d   : > { %p858_p4 = pneg %p857_p12 }
  0x3e   : > { %p864_p8 = por %p863_p7, %p862_p5 }
  0x3f   : > { %707 = vmatpush3.bf16.msra.mxu0 %v789_v2 }
  0x40   : > { %708 = vmatprep.subr.bf16.mxu0 %v790_v3  ;;  %p865_p9 = pnand %p864_p8, %p858_p4 }
  0x43   : > { %709 = vmatpush3.bf16.msra.mxu0 %v790_v3 }
  0x44   : > { %710 = vmatprep.subr.bf16.mxu0 %v791_v7 }
  0x47   : > { %711 = vmatpush3.bf16.msra.mxu0 %v791_v7 }
  0x48   : > { %712 = vmatprep.subr.bf16.mxu0 %v792_v8 }
  0x4b   : > { %713 = vmatpush3.bf16.msra.mxu0 %v792_v8 }
  0x4c   : > { %714 = vmatprep.subr.bf16.mxu0 %v793_v9 }
  0x4f   : > { %715 = vmatpush3.bf16.msra.mxu0 %v793_v9 }
  0x50   : > { %716 = vmatprep.subr.bf16.mxu0 %v794_v10 }
  0x53   : > { %717 = vmatpush3.bf16.msra.mxu0 %v794_v10 }
  0x56   : > { %719 = vmatmul.mubr.bf16.vlgmr.msra.gmra.mxu0 %v255_v15 }
  0x57   : > { %722 = vmatprep.mubr.bf16.mxu0 %v256_v16 }
  0x5e   : > { %723 = vmatmul.mubr.bf16.gmra.mxu0 %v257_v19 }
 0x116   : > { %v720_v22 = vpop.f32.mrf.mxu0 }
 0x117   : > { %v372_v28 = vadd.f32 %v720_v22, %v656_v24 }
 0x118   : > { %v363_v23 = vpop.f32.mrf.mxu0 }
 0x119   : > { %v364_v26 = vadd.f32 %v656_v24, %v363_v23  ;;  %v396_v35 = vmax.f32 %v372_v28, 0.0 }
 0x11a   : > { %v721_v25 = vpop.f32.mrf.mxu0 }
 0x11b   : > { %v375_v27 = vadd.f32 %v721_v25, %v656_v24  ;;  %v394_v33 = vmax.f32 %v364_v26, 0.0 }
 0x11c   : > { %v366_v29 = vpop.f32.mrf.mxu0 }
 0x11d   : > { %v367_v30 = vadd.f32 %v656_v24, %v366_v29  ;;  %v397_v31 = vmax.f32 %v375_v27, 0.0 }
 0x11e   : > { %v724_v32 = vpop.f32.mrf.mxu0 }
 0x11f   : > { %v395_v34 = vmax.f32 %v367_v30, 0.0  ;;  %v403_v38 = vpack.c.bf16 %v397_v31, %v396_v35  ;;  %v388_v42 = vadd.f32 %v724_v32, %v656_v24 }
 0x120   : > { %v379_v36 = vpop.f32.mrf.mxu0 }
 0x121   : > { %v402_v37 = vpack.c.bf16 %v395_v34, %v394_v33  ;;  %v380_v40 = vadd.f32 %v656_v24, %v379_v36  ;;  %v400_v48 = vmax.f32 %v388_v42, 0.0 }
 0x122   : > { %v725_v39 = vpop.f32.mrf.mxu0 }
 0x123   : > { %v391_v41 = vadd.f32 %v725_v39, %v656_v24  ;;  %728 = vmatprep.mubr.msk.bf16.mxu1 %vm414_vm1, %v402_v37  ;;  %v398_v46 = vmax.f32 %v380_v40, 0.0 }
 0x124   : > { %v382_v43 = vpop.f32.mrf.mxu0  ;;  %729 = vmatmul.mubr.msk.bf16.vlgmr.msra.gmra.mxu1 %vm414_vm1, %v403_v38 }
 0x125   : > { %v383_v44 = vadd.f32 %v656_v24, %v382_v43  ;;  %v401_v45 = vmax.f32 %v391_v41, 0.0 }
 0x127   : > { %v399_v47 = vmax.f32 %v383_v44, 0.0  ;;  %v405_v50 = vpack.c.bf16 %v401_v45, %v400_v48 }
 0x129   : > { %v404_v49 = vpack.c.bf16 %v399_v47, %v398_v46 }
 0x12b   : > { %732 = vmatprep.mubr.msk.bf16.mxu1 %vm414_vm1, %v404_v49 }
 0x12c   : > { %733 = vmatmul.mubr.msk.bf16.gmra.mxu1 %vm414_vm1, %v405_v50 }
 0x1e4   : > { %v730_v52 = vpop.f32.mrf.mxu1 }
 0x1e5   : > { %v474_v53 = vadd.f32 %v730_v52, %v665_v51 }
 0x1e6   : > { %v465_v54 = vpop.f32.mrf.mxu1 }
 0x1e7   : > { %v672_v55 = vmul.f32 -1.442695, %v474_v53  ;;  %v466_v56 = vadd.f32 %v665_v51, %v465_v54 }
 0x1e8   : > { %v731_v57 = vpop.f32.mrf.mxu1 }
 0x1e9   : > { %795 = vpow2.f32 %v672_v55  ;;  %v670_v58 = vmul.f32 -1.442695, %v466_v56  ;;  %v477_v59 = vadd.f32 %v731_v57, %v665_v51 }
 0x1ea   : > { %v468_v60 = vpop.f32.mrf.mxu1 }
 0x1eb   : > { %797 = vpow2.f32 %v670_v58  ;;  %v673_v61 = vmul.f32 -1.442695, %v477_v59  ;;  %v469_v62 = vadd.f32 %v665_v51, %v468_v60 }
 0x1ec   : > { %v734_v63 = vpop.f32.mrf.mxu1 }
 0x1ed   : > { %799 = vpow2.f32 %v673_v61  ;;  %v671_v0 = vmul.f32 -1.442695, %v469_v62  ;;  %v490_v1 = vadd.f32 %v734_v63, %v665_v51 }
 0x1ee   : > { %v481_v2 = vpop.f32.mrf.mxu1 }
 0x1ef   : > { %801 = vpow2.f32 %v671_v0  ;;  %v676_v3 = vmul.f32 -1.442695, %v490_v1  ;;  %v482_v6 = vadd.f32 %v665_v51, %v481_v2 }
 0x1f0   : > { %v735_v7 = vpop.f32.mrf.mxu1 }
 0x1f1   : > { %803 = vpow2.f32 %v676_v3  ;;  %v674_v8 = vmul.f32 -1.442695, %v482_v6  ;;  %v493_v9 = vadd.f32 %v735_v7, %v665_v51 }
 0x1f2   : > { %v484_v10 = vpop.f32.mrf.mxu1 }
 0x1f3   : > { %805 = vpow2.f32 %v674_v8  ;;  %v677_v15 = vmul.f32 -1.442695, %v493_v9  ;;  %v485_v16 = vadd.f32 %v665_v51, %v484_v10 }
 0x1f5   : > { %807 = vpow2.f32 %v677_v15  ;;  %v675_v19 = vmul.f32 -1.442695, %v485_v16 }
 0x1f6   : > { %v796_v20 = vpop.eup %795 }
 0x1f7   : > { %v522_v21 = vadd.f32 1.0, %v796_v20  ;;  %809 = vpow2.f32 %v675_v19 }
 0x1f8   : > { %v798_v22 = vpop.eup %797 }
 0x1f9   : > { %811 = vrcp.f32 %v522_v21  ;;  %v520_v23 = vadd.f32 1.0, %v798_v22 }
 0x1fa   : > { %v800_v24 = vpop.eup %799 }
 0x1fb   : > { %813 = vrcp.f32 %v520_v23  ;;  %v523_v25 = vadd.f32 1.0, %v800_v24 }
 0x1fc   : > { %v802_v26 = vpop.eup %801 }
 0x1fd   : > { %815 = vrcp.f32 %v523_v25  ;;  %v521_v27 = vadd.f32 1.0, %v802_v26 }
 0x1fe   : > { %v804_v28 = vpop.eup %803 }
 0x1ff   : > { %817 = vrcp.f32 %v521_v27  ;;  %v526_v29 = vadd.f32 1.0, %v804_v28 }
 0x200   : > { %v806_v30 = vpop.eup %805 }
 0x201   : > { %819 = vrcp.f32 %v526_v29  ;;  %v524_v31 = vadd.f32 1.0, %v806_v30 }
 0x202   : > { %v808_v32 = vpop.eup %807 }
 0x203   : > { %821 = vrcp.f32 %v524_v31  ;;  %v527_v33 = vadd.f32 1.0, %v808_v32 }
 0x204   : > { %v810_v34 = vpop.eup %809 }
 0x205   : > { %823 = vrcp.f32 %v527_v33  ;;  %v525_v35 = vadd.f32 1.0, %v810_v34 }
 0x206   : > { %v812_v36 = vpop.eup %811 }
 0x207   : > { %v546_v37 = vmul.f32 %v812_v36, %v1098_v11  ;;  %825 = vrcp.f32 %v525_v35 }
 0x208   : > { %v814_v38 = vpop.eup %813 }
 0x209   : > { %554 = vst [vmem:[%s242_s10 + $0x10] sm:$0xff] %v546_v37  ;;  %v544_v39 = vmul.f32 %v814_v38, %v1078_v4 }
 0x20a   : > { %v816_v40 = vpop.eup %815 }
 0x20b   : > { %552 = vst [vmem:[%s242_s10] sm:$0xff] %v544_v39  ;;  %v547_v41 = vmul.f32 %v816_v40, %v1101_v12 }
 0x20c   : > { %v818_v42 = vpop.eup %817 }
 0x20d   : > { %555 = vst [vmem:[%s242_s10 + $0x18] sm:$0xff] %v547_v41  ;;  %v545_v43 = vmul.f32 %v818_v42, %v1081_v5 }
 0x20e   : > { %v820_v44 = vpop.eup %819 }
 0x20f   : > { %553 = vst [vmem:[%s242_s10 + $0x8] sm:$0xff] %v545_v43  ;;  %v550_v11 = vmul.f32 %v820_v44, %v1114_v17 }
 0x210   : > { %v822_v45 = vpop.eup %821 }
 0x211   : > { %558 = vst [vmem:[%s242_s10 + $0x30] sm:$0xff] %v550_v11  ;;  %v548_v46 = vmul.f32 %v822_v45, %v1104_v13 }
 0x212   : > { %v824_v4 = vpop.eup %823 }
 0x213   : > { %556 = vst [vmem:[%s242_s10 + $0x20] sm:$0xff] %v548_v46  ;;  %v551_v12 = vmul.f32 %v824_v4, %v1117_v18 }
 0x214   : > { %v826_v47 = vpop.eup %825 }
 0x215   : > { %559 = vst [vmem:[%s242_s10 + $0x38] sm:$0xff] %v551_v12  ;;  %v549_v5 = vmul.f32 %v826_v47, %v1107_v14 }
 0x217   : > { %557 = vst [vmem:[%s242_s10 + $0x28] sm:$0xff] %v549_v5 }
 0x218   : > { %868 = shalt.err (!%p865_p9)
}
 0x219   : > { %s869_s8 = scalar_lea.hbm %s1147_s26, 1024  ;;  %s873_s28 = scalar_lea.hbm %s1197_s5, 4096 }
 0x21a   : > { %p870_p13 = scmp.ne.s32.totalorder %s1147_s26, %s869_s8  ;;  %p874_p2 = scmp.lt.s32.totalorder %s1147_s26, %s1197_s5 }
 0x21b   : > { %p875_p3 = scmp.lt.s32.totalorder %s873_s28, %s869_s8 }
 0x21c   : > { %p871_p1 = pnand %p870_p13, %p1206_p11 }
 0x21d   : > { %p876_p6 = por %p875_p3, %p874_p2 }
 0x21e   : > { %p872_p0 = pneg %p871_p1 }
 0x220   : > { %p877_p10 = pnand %p876_p6, %p872_p0 }
 0x222   : > { %880 = shalt.err (!%p877_p10)
}
 0x223   : > { %s925_s25 = smov 128   ;;  %s926_s13 = smov 8  }
 0x224   : > { %739 = dma.vmem_to_hbm [thread:$0]  (%p1206_p11), %s1149_s11, 1024, %s1147_s26, %s561_s22, %s925_s25, %s925_s25, %s926_s13  }
 0x225 PF: > { %p750_p12 = scmp.ge.s32.totalorder %s919_s21, 2  ;;  %s589_s17 = sand.u32 1, %s907_s18  }
 0x226   : > { %p1207_p4 = scmp.ne.s32.totalorder %s1203_s6, 0  ;;  %s590_s12 = scalar_lea.sflag [#allocation4], %s589_s17 }
 0x228   : > { %p746_p5 = pnand %p750_p12, %p1207_p4 }
 0x22a   : > { %p747_p7 = pneg %p746_p5 }
 0x22c   : > { %902 = dma.done.wait (%p747_p7), %s590_s12, 1024  }
 0x22d   : > { %904 = vsyncadd (%p747_p7), %s590_s12, 4294966272  ;;  %p18_p8 = scmp.ge.s32.totalorder %s982_s24, 6   ;;  %s1208_s18 = smov %s911_s19 }
 0x22e   : > { %s1209_s19 = smov %s915_s20  ;;  %s1210_s20 = smov %s994_s27 }
 0x22f   : > { %s1211_s21 = smov %s982_s24  ;;  %20 = sbr.rel (!%p18_p8) target bundleno = 5 (0x5), region = 85 }
 0x234   :  { %595 = vsyncpa [#allocation3], 1 }
 0x235   :  { %597 = vsyncpa [#allocation3 + $0x1], 1 }
 0x236   :  { %598 = vsyncpa [#allocation4], 1 }
 0x237   :  { %600 = vsyncpa [#allocation4 + $0x1], 1 }

</bundles_post_ra>
